<compile_context>
chip_gen: v7x
topology: tpu7x:2x2x1
jax: 0.10.0
libtpu: 0.0.40
codegen_flags: <defaults>
</compile_context>

<pallas_src>
import jax
import jax.numpy as jnp
from jax.experimental import pallas as pl
from jax.experimental.pallas import tpu as pltpu


# ----------------------------- Pallas kernel --------------------------------
def _discriminator_kernel(obs_ref, act_ref,
                          w_s_ref, b_s_ref, w_a_ref, b_a_ref,
                          w_h1s_ref, w_h1a_ref, b_h1_ref,
                          w2_row_ref, b2_ref,
                          out_ref):
    cdt = w_s_ref.dtype                      # compute (MXU feed) dtype
    obs = obs_ref[...].astype(cdt)           # in-kernel cast (free on VPU)
    act = act_ref[...].astype(cdt)

    # Encoders (single linear + ReLU each), f32 accumulation.
    s = jnp.dot(obs, w_s_ref[...], preferred_element_type=jnp.float32) + b_s_ref[...]
    s = jnp.maximum(s, 0.0)
    a = jnp.dot(act, w_a_ref[...], preferred_element_type=jnp.float32) + b_a_ref[...]
    a = jnp.maximum(a, 0.0)

    # Head hidden layer with split weight (== concat([s, a]) @ w_h1).
    h1 = (jnp.dot(s.astype(cdt), w_h1s_ref[...], preferred_element_type=jnp.float32)
          + jnp.dot(a.astype(cdt), w_h1a_ref[...], preferred_element_type=jnp.float32)
          + b_h1_ref[...])
    h1 = jnp.maximum(h1, 0.0)                # (tile_b, H) f32

    # hidden -> 1 projection as a lane-dense row: (1, H) @ (H, tile_b) on the
    # MXU (MXU/XLU slots have huge slack here), plus SMEM scalar bias.
    logits_row = jnp.dot(w2_row_ref[...], h1.T,
                         preferred_element_type=jnp.float32) + b2_ref[0, 0]
    out_ref[...] = logits_row.astype(out_ref.dtype)      # (1, tile_b), unmasked vst


# ----------------------------- defaults / params ----------------------------
def _tpu_defaults():
    """(tile_b, vmem_limit_bytes) sized per TPU generation."""
    try:
        kind = jax.devices()[0].device_kind.lower()
    except Exception:
        kind = ""
    # v5e / v6e (Trillium): 128 MiB physical VMEM.
    if any(t in kind for t in ("v5 lite", "v5e", "v5litepod", "v6", "trillium")):
        return 16384, 96 * 1024 * 1024
    # v7x (64 MiB physical) and unknown: conservative.
    return 8192, 48 * 1024 * 1024


def prepare_params(p, compute_dtype=jnp.float32):
    """Lay parameters out in kernel-friendly shapes (done once)."""
    obs_dim, repr_dim = p["w_s"].shape
    act_dim = p["w_a"].shape[0]
    hidden = p["w_h1"].shape[1]
    return {
        "w_s": p["w_s"].astype(compute_dtype),                 # (obs_dim, R)
        "b_s": p["b_s"],                                       # (1, R) f32
        "w_a": p["w_a"].astype(compute_dtype),                 # (act_dim, R)
        "b_a": p["b_a"],                                       # (1, R) f32
        "w_h1_s": p["w_h1"][:repr_dim].astype(compute_dtype),  # (R, H)
        "w_h1_a": p["w_h1"][repr_dim:].astype(compute_dtype),  # (R, H)
        "b_h1": p["b_h1"],                                     # (1, H) f32
        "w2_row": p["w_h2"].T,                                 # (1, H) f32, lane-dense
        "b_h2": p["b_h2"],                                     # (1, 1) f32 -> SMEM
        "obs_dim": obs_dim, "act_dim": act_dim,
        "repr_dim": repr_dim, "hidden": hidden,
        "compute_dtype": compute_dtype,
    }


# ----------------------------- wrapper ---------------------------------------
def smodice_discriminator_forward(obs, act, params, *, tile_b=None,
                                  vmem_limit_bytes=None):
    """Discriminator forward: obs (B, obs_dim), act (B, act_dim) -> (B, 1) f32."""
    B = obs.shape[0]
    obs_dim, act_dim = params["obs_dim"], params["act_dim"]
    R, H = params["repr_dim"], params["hidden"]
    cdt = params["compute_dtype"]

    def_tb, def_vmem = _tpu_defaults()
    tile_b = def_tb if tile_b is None else tile_b
    vmem_limit_bytes = def_vmem if vmem_limit_bytes is None else vmem_limit_bytes

    tb = B if B <= tile_b else tile_b
    num_tiles = pl.cdiv(B, tb)

    w_item = jnp.dtype(cdt).itemsize
    flops = 2 * B * (obs_dim * R + act_dim * R + 2 * R * H + H)
    bytes_accessed = int(
        B * (obs_dim + act_dim) * 4 + B * 4
        + (obs_dim * R + act_dim * R + 2 * R * H + H) * w_item
        + (2 * R + H + 1) * 4)

    resident = lambda shape: pl.BlockSpec(shape, lambda i: (0, 0))

    out = pl.pallas_call(
        _discriminator_kernel,
        out_shape=jax.ShapeDtypeStruct((num_tiles, tb), jnp.float32),
        grid=(num_tiles,),
        in_specs=[
            pl.BlockSpec((tb, obs_dim), lambda i: (i, 0)),     # obs stream (f32)
            pl.BlockSpec((tb, act_dim), lambda i: (i, 0)),     # act stream (f32)
            resident((obs_dim, R)),                            # w_s
            resident((1, R)),                                  # b_s
            resident((act_dim, R)),                            # w_a
            resident((1, R)),                                  # b_a
            resident((R, H)),                                  # w_h1_s
            resident((R, H)),                                  # w_h1_a
            resident((1, H)),                                  # b_h1
            resident((1, H)),                                  # w2 row
            pl.BlockSpec(memory_space=pltpu.MemorySpace.SMEM), # b_h2 scalar
        ],
        out_specs=pl.BlockSpec((1, tb), lambda i: (i, 0)),     # lane-dense logits row
        compiler_params=pltpu.CompilerParams(
            dimension_semantics=("parallel",),
            vmem_limit_bytes=vmem_limit_bytes,
        ),
        cost_estimate=pl.CostEstimate(
            flops=flops, transcendentals=0, bytes_accessed=bytes_accessed),
    )(obs, act,
      params["w_s"], params["b_s"], params["w_a"], params["b_a"],
      params["w_h1_s"], params["w_h1_a"], params["b_h1"],
      params["w2_row"], params["b_h2"])

    # (num_tiles, tb) -> (B, 1); padded tail lanes of the last tile are dropped.
    return out.reshape(-1)[:B].reshape(B, 1)


# ----------------------------- parameter setup ------------------------------
def init_params(key, obs_dim, act_dim, repr_dim, hidden_dim):
    ks = jax.random.split(key, 8)
    scale = 0.1
    return {
        "w_s":  scale * jax.random.normal(ks[0], (obs_dim, repr_dim), jnp.float32),
        "b_s":  scale * jax.random.normal(ks[1], (1, repr_dim), jnp.float32),
        "w_a":  scale * jax.random.normal(ks[2], (act_dim, repr_dim), jnp.float32),
        "b_a":  scale * jax.random.normal(ks[3], (1, repr_dim), jnp.float32),
        "w_h1": scale * jax.random.normal(ks[4], (2 * repr_dim, hidden_dim), jnp.float32),
        "b_h1": scale * jax.random.normal(ks[5], (1, hidden_dim), jnp.float32),
        "w_h2": scale * jax.random.normal(ks[6], (hidden_dim, 1), jnp.float32),
        "b_h2": scale * jax.random.normal(ks[7], (1, 1), jnp.float32),
    }


def reference_forward(obs, act, p):
    s = jnp.maximum(obs @ p["w_s"] + p["b_s"], 0.0)
    a = jnp.maximum(act @ p["w_a"] + p["b_a"], 0.0)
    h = jnp.concatenate([s, a], axis=-1)
    h1 = jnp.maximum(h @ p["w_h1"] + p["b_h1"], 0.0)
    return h1 @ p["w_h2"] + p["b_h2"]


# ----------------------------- SMODICENetwork -------------------------------
class SMODICENetworkPallas:
    """Mirrors SMODICENetwork: encoder=Identity, actor/value are opaque plugin
    classes (no fixed forward); the discriminator is the kernelized component."""

    def __init__(self, obs_dim, act_dim, repr_dim=32, hidden_dim=32, key=None,
                 compute_dtype=jnp.float32):
        self.obs_dim = obs_dim
        self.act_dim = act_dim
        self.params = init_params(key, obs_dim, act_dim, repr_dim, hidden_dim)
        self.prepared = prepare_params(self.params, compute_dtype)

    # encoder = nn.Identity
    def encoder(self, obs):
        return obs

    def format_policy_obs(self, obs):
        return obs

    def format_value_obs(self, obs):
        return obs

    def format_discriminator_input(self, obs, action):
        return (obs, action)

    def discriminator(self, obs, act, tile_b=None, vmem_limit_bytes=None):
        return smodice_discriminator_forward(obs, act, self.prepared,
                                             tile_b=tile_b,
                                             vmem_limit_bytes=vmem_limit_bytes)

    def discriminator_forward_with_concat(self, obs_act):
        obs, act = obs_act[:, :self.obs_dim], obs_act[:, self.obs_dim:]
        return self.discriminator(obs, act)

    def discriminator_predict_reward(self, obs, act):
        d = self.discriminator(obs, act)
        s = jax.nn.sigmoid(d)
        return jnp.log(s) - jnp.log(1.0 - s)

    # TODO(synk): SMODICENetwork.forward raises NotImplementedError in the
    # reference; actor/value/encoder are user-supplied plugin classes and the
    # discriminator loss / grad_pen rely on autograd (use jax.grad around the
    # wrapper) — not kernelized here.


# ---------------------------------- main -------------------------------------
if __name__ == "__main__":
    key = jax.random.PRNGKey(0)
    k_obs, k_act, k_par = jax.random.split(key, 3)

    B, OBS_DIM, ACT_DIM = 8, 11, 3
    REPR_DIM, HIDDEN_DIM = 32, 32

    obs = jax.random.normal(k_obs, (B, OBS_DIM), jnp.float32)
    act = jax.random.normal(k_act, (B, ACT_DIM), jnp.float32)

    net = SMODICENetworkPallas(OBS_DIM, ACT_DIM, REPR_DIM, HIDDEN_DIM, key=k_par)

    # 1) f32 path, single-tile grid.
    logits = net.discriminator(obs, act)
    jax.block_until_ready(logits)
    ref = reference_forward(obs, act, net.params)
    assert logits.shape == (B, 1)
    assert jnp.allclose(logits, ref, atol=5e-5, rtol=5e-5), "f32 mismatch vs reference"

    # 2) multi-step batch grid (weights resident across tiles, lane-dense out).
    B2 = 24
    k2o, k2a = jax.random.split(jax.random.PRNGKey(1))
    obs2 = jax.random.normal(k2o, (B2, OBS_DIM), jnp.float32)
    act2 = jax.random.normal(k2a, (B2, ACT_DIM), jnp.float32)
    logits2 = net.discriminator(obs2, act2, tile_b=8)
    jax.block_until_ready(logits2)
    ref2 = reference_forward(obs2, act2, net.params)
    assert jnp.allclose(logits2, ref2, atol=5e-5, rtol=5e-5), "tiled mismatch vs reference"

    # 3) non-multiple batch (B % tile_b != 0): padded rows must not leak out.
    B3 = 20
    k3o, k3a = jax.random.split(jax.random.PRNGKey(2))
    obs3 = jax.random.normal(k3o, (B3, OBS_DIM), jnp.float32)
    act3 = jax.random.normal(k3a, (B3, ACT_DIM), jnp.float32)
    logits3 = net.discriminator(obs3, act3, tile_b=8)
    jax.block_until_ready(logits3)
    ref3 = reference_forward(obs3, act3, net.params)
    assert logits3.shape == (B3, 1)
    assert jnp.allclose(logits3, ref3, atol=5e-5, rtol=5e-5), "ragged-tile mismatch vs reference"

    # 4) bf16 weights path: activations streamed f32, cast in-kernel — looser tol.
    net_bf16 = SMODICENetworkPallas(OBS_DIM, ACT_DIM, REPR_DIM, HIDDEN_DIM,
                                    key=k_par, compute_dtype=jnp.bfloat16)
    logits_bf16 = net_bf16.discriminator(obs, act)
    jax.block_until_ready(logits_bf16)
    assert jnp.allclose(logits_bf16, ref, atol=5e-2, rtol=5e-2), "bf16 mismatch vs reference"

    print("KERNEL_OK")
</pallas_src>

<mosaic_0001>
module attributes {stable_mosaic.version = 11 : i64} {
  func.func @_discriminator_kernel(%arg0: i32, %arg1: memref<8x11xf32, #tpu.memory_space<vmem>>, %arg2: memref<8x3xf32, #tpu.memory_space<vmem>>, %arg3: memref<11x32xf32, #tpu.memory_space<vmem>>, %arg4: memref<1x32xf32, #tpu.memory_space<vmem>>, %arg5: memref<3x32xf32, #tpu.memory_space<vmem>>, %arg6: memref<1x32xf32, #tpu.memory_space<vmem>>, %arg7: memref<32x32xf32, #tpu.memory_space<vmem>>, %arg8: memref<32x32xf32, #tpu.memory_space<vmem>>, %arg9: memref<1x32xf32, #tpu.memory_space<vmem>>, %arg10: memref<1x32xf32, #tpu.memory_space<vmem>>, %arg11: memref<1x1xf32, #tpu.memory_space<smem>>, %arg12: memref<1x8xf32, #tpu.memory_space<vmem>>) attributes {dimension_semantics = [#tpu.dimension_semantics<parallel>], iteration_bounds = array<i64: 1>, scalar_prefetch = 0 : i64, scratch_operands = 0 : i64, tpu.core_type = #tpu.core_type<tc>, window_params = [{transform_indices = @transform_0, window_bounds = array<i64: 8, 11>}, {transform_indices = @transform_1, window_bounds = array<i64: 8, 3>}, {pipeline_mode = #tpu.pipeline_mode<synchronous>, transform_indices = @transform_2, window_bounds = array<i64: 11, 32>}, {pipeline_mode = #tpu.pipeline_mode<synchronous>, transform_indices = @transform_3, window_bounds = array<i64: 1, 32>}, {pipeline_mode = #tpu.pipeline_mode<synchronous>, transform_indices = @transform_4, window_bounds = array<i64: 3, 32>}, {pipeline_mode = #tpu.pipeline_mode<synchronous>, transform_indices = @transform_5, window_bounds = array<i64: 1, 32>}, {pipeline_mode = #tpu.pipeline_mode<synchronous>, transform_indices = @transform_6, window_bounds = array<i64: 32, 32>}, {pipeline_mode = #tpu.pipeline_mode<synchronous>, transform_indices = @transform_7, window_bounds = array<i64: 32, 32>}, {pipeline_mode = #tpu.pipeline_mode<synchronous>, transform_indices = @transform_8, window_bounds = array<i64: 1, 32>}, {pipeline_mode = #tpu.pipeline_mode<synchronous>, transform_indices = @transform_9, window_bounds = array<i64: 1, 32>}, {transform_indices = @transform_10, window_bounds = array<i64: 1, 1>}, {transform_indices = @transform_11, window_bounds = array<i64: 1, 8>}]} {
    %c0 = arith.constant 0 : index
    %c0_0 = arith.constant 0 : index
    %0 = vector.load %arg1[%c0, %c0_0] : memref<8x11xf32, #tpu.memory_space<vmem>>, vector<8x11xf32>
    %c0_1 = arith.constant 0 : index
    %c0_2 = arith.constant 0 : index
    %1 = vector.load %arg2[%c0_1, %c0_2] : memref<8x3xf32, #tpu.memory_space<vmem>>, vector<8x3xf32>
    %c0_3 = arith.constant 0 : index
    %c0_4 = arith.constant 0 : index
    %2 = vector.load %arg3[%c0_3, %c0_4] : memref<11x32xf32, #tpu.memory_space<vmem>>, vector<11x32xf32>
    %cst = arith.constant dense<0.000000e+00> : vector<8x32xf32>
    %3 = tpu.matmul %0, %2, %cst {dimension_numbers = #tpu.dot_dimension_numbers<[1], [0], [0], [1], [0, 0, 1, 1], [], []>} : vector<8x11xf32>, vector<11x32xf32>, vector<8x32xf32> -> vector<8x32xf32>
    %c0_5 = arith.constant 0 : index
    %c0_6 = arith.constant 0 : index
    %4 = vector.load %arg4[%c0_5, %c0_6] : memref<1x32xf32, #tpu.memory_space<vmem>>, vector<1x32xf32>
    %5 = vector.broadcast %4 : vector<1x32xf32> to vector<8x32xf32>
    %6 = arith.addf %3, %5 : vector<8x32xf32>
    %cst_7 = arith.constant 0.000000e+00 : f32
    %7 = vector.broadcast %cst_7 : f32 to vector<8x32xf32>
    %8 = arith.maximumf %6, %7 : vector<8x32xf32>
    %c0_8 = arith.constant 0 : index
    %c0_9 = arith.constant 0 : index
    %9 = vector.load %arg5[%c0_8, %c0_9] : memref<3x32xf32, #tpu.memory_space<vmem>>, vector<3x32xf32>
    %cst_10 = arith.constant dense<0.000000e+00> : vector<8x32xf32>
    %10 = tpu.matmul %1, %9, %cst_10 {dimension_numbers = #tpu.dot_dimension_numbers<[1], [0], [0], [1], [0, 0, 1, 1], [], []>} : vector<8x3xf32>, vector<3x32xf32>, vector<8x32xf32> -> vector<8x32xf32>
    %c0_11 = arith.constant 0 : index
    %c0_12 = arith.constant 0 : index
    %11 = vector.load %arg6[%c0_11, %c0_12] : memref<1x32xf32, #tpu.memory_space<vmem>>, vector<1x32xf32>
    %12 = vector.broadcast %11 : vector<1x32xf32> to vector<8x32xf32>
    %13 = arith.addf %10, %12 : vector<8x32xf32>
    %cst_13 = arith.constant 0.000000e+00 : f32
    %14 = vector.broadcast %cst_13 : f32 to vector<8x32xf32>
    %15 = arith.maximumf %13, %14 : vector<8x32xf32>
    %c0_14 = arith.constant 0 : index
    %c0_15 = arith.constant 0 : index
    %16 = vector.load %arg7[%c0_14, %c0_15] : memref<32x32xf32, #tpu.memory_space<vmem>>, vector<32x32xf32>
    %cst_16 = arith.constant dense<0.000000e+00> : vector<8x32xf32>
    %17 = tpu.matmul %8, %16, %cst_16 {dimension_numbers = #tpu.dot_dimension_numbers<[1], [0], [0], [1], [0, 0, 1, 1], [], []>} : vector<8x32xf32>, vector<32x32xf32>, vector<8x32xf32> -> vector<8x32xf32>
    %c0_17 = arith.constant 0 : index
    %c0_18 = arith.constant 0 : index
    %18 = vector.load %arg8[%c0_17, %c0_18] : memref<32x32xf32, #tpu.memory_space<vmem>>, vector<32x32xf32>
    %cst_19 = arith.constant dense<0.000000e+00> : vector<8x32xf32>
    %19 = tpu.matmul %15, %18, %cst_19 {dimension_numbers = #tpu.dot_dimension_numbers<[1], [0], [0], [1], [0, 0, 1, 1], [], []>} : vector<8x32xf32>, vector<32x32xf32>, vector<8x32xf32> -> vector<8x32xf32>
    %20 = arith.addf %17, %19 : vector<8x32xf32>
    %c0_20 = arith.constant 0 : index
    %c0_21 = arith.constant 0 : index
    %21 = vector.load %arg9[%c0_20, %c0_21] : memref<1x32xf32, #tpu.memory_space<vmem>>, vector<1x32xf32>
    %22 = vector.broadcast %21 : vector<1x32xf32> to vector<8x32xf32>
    %23 = arith.addf %20, %22 : vector<8x32xf32>
    %cst_22 = arith.constant 0.000000e+00 : f32
    %24 = vector.broadcast %cst_22 : f32 to vector<8x32xf32>
    %25 = arith.maximumf %23, %24 : vector<8x32xf32>
    %c0_23 = arith.constant 0 : index
    %c0_24 = arith.constant 0 : index
    %26 = vector.load %arg10[%c0_23, %c0_24] : memref<1x32xf32, #tpu.memory_space<vmem>>, vector<1x32xf32>
    %27 = tpu.transpose %25, [1, 0] : vector<8x32xf32> -> vector<32x8xf32>
    %cst_25 = arith.constant dense<0.000000e+00> : vector<1x8xf32>
    %28 = tpu.matmul %26, %27, %cst_25 {dimension_numbers = #tpu.dot_dimension_numbers<[1], [0], [0], [1], [0, 0, 1, 1], [], []>} : vector<1x32xf32>, vector<32x8xf32>, vector<1x8xf32> -> vector<1x8xf32>
    %c0_26 = arith.constant 0 : index
    %c0_27 = arith.constant 0 : index
    %29 = memref.load %arg11[%c0_26, %c0_27] : memref<1x1xf32, #tpu.memory_space<smem>>
    %30 = vector.broadcast %29 : f32 to vector<1x8xf32>
    %31 = arith.addf %28, %30 : vector<1x8xf32>
    %c0_28 = arith.constant 0 : index
    %c0_29 = arith.constant 0 : index
    %32 = vector.load %arg12[%c0_28, %c0_29] : memref<1x8xf32, #tpu.memory_space<vmem>>, vector<1x8xf32>
    tpu.vector_store %arg12[%c0_28, %c0_29], %31 {strides = array<i32>} : memref<1x8xf32, #tpu.memory_space<vmem>>, vector<1x8xf32>,
    return
  }
  func.func @transform_0(%arg0: i32) -> (i32, i32) {
    %c0_i32 = arith.constant 0 : i32
    %c0_i32_0 = arith.constant 0 : i32
    return %arg0, %c0_i32 : i32, i32
  }
  func.func @transform_1(%arg0: i32) -> (i32, i32) {
    %c0_i32 = arith.constant 0 : i32
    %c0_i32_0 = arith.constant 0 : i32
    return %arg0, %c0_i32 : i32, i32
  }
  func.func @transform_2(%arg0: i32) -> (i32, i32) {
    %c0_i32 = arith.constant 0 : i32
    %c0_i32_0 = arith.constant 0 : i32
    %c0_i32_1 = arith.constant 0 : i32
    return %c0_i32, %c0_i32_0 : i32, i32
  }
  func.func @transform_3(%arg0: i32) -> (i32, i32) {
    %c0_i32 = arith.constant 0 : i32
    %c0_i32_0 = arith.constant 0 : i32
    %c0_i32_1 = arith.constant 0 : i32
    return %c0_i32, %c0_i32_0 : i32, i32
  }
  func.func @transform_4(%arg0: i32) -> (i32, i32) {
    %c0_i32 = arith.constant 0 : i32
    %c0_i32_0 = arith.constant 0 : i32
    %c0_i32_1 = arith.constant 0 : i32
    return %c0_i32, %c0_i32_0 : i32, i32
  }
  func.func @transform_5(%arg0: i32) -> (i32, i32) {
    %c0_i32 = arith.constant 0 : i32
    %c0_i32_0 = arith.constant 0 : i32
    %c0_i32_1 = arith.constant 0 : i32
    return %c0_i32, %c0_i32_0 : i32, i32
  }
  func.func @transform_6(%arg0: i32) -> (i32, i32) {
    %c0_i32 = arith.constant 0 : i32
    %c0_i32_0 = arith.constant 0 : i32
    %c0_i32_1 = arith.constant 0 : i32
    return %c0_i32, %c0_i32_0 : i32, i32
  }
  func.func @transform_7(%arg0: i32) -> (i32, i32) {
    %c0_i32 = arith.constant 0 : i32
    %c0_i32_0 = arith.constant 0 : i32
    %c0_i32_1 = arith.constant 0 : i32
    return %c0_i32, %c0_i32_0 : i32, i32
  }
  func.func @transform_8(%arg0: i32) -> (i32, i32) {
    %c0_i32 = arith.constant 0 : i32
    %c0_i32_0 = arith.constant 0 : i32
    %c0_i32_1 = arith.constant 0 : i32
    return %c0_i32, %c0_i32_0 : i32, i32
  }
  func.func @transform_9(%arg0: i32) -> (i32, i32) {
    %c0_i32 = arith.constant 0 : i32
    %c0_i32_0 = arith.constant 0 : i32
    %c0_i32_1 = arith.constant 0 : i32
    return %c0_i32, %c0_i32_0 : i32, i32
  }
  func.func @transform_10(%arg0: i32) -> (i32, i32) {
    %c0_i32 = arith.constant 0 : i32
    %c0_i32_0 = arith.constant 0 : i32
    %c0_i32_1 = arith.constant 0 : i32
    return %c0_i32, %c0_i32_0 : i32, i32
  }
  func.func @transform_11(%arg0: i32) -> (i32, i32) {
    %c0_i32 = arith.constant 0 : i32
    %c0_i32_0 = arith.constant 0 : i32
    return %arg0, %c0_i32 : i32, i32
  }
}

</mosaic_0001>

<bundles_post_ra>
// kernel: tpu_custom_call.1
= control target key start
LH: loop header
LB: loop body
LE: loop exit
PB: predicated region body
PF: predicated region fallthrough
CT: control target
= control target key end

     0   :  { %17 = vsyncpa [#allocation4], 0  ;;  %s869_s0 = inlined_call_operand.hbm [shape: f32[8,11], index: 0, kind: input, shape index: {}]   ;;  %s870_s1 = inlined_call_operand.vmem [shape: f32[8,3], index: 1, kind: input, shape index: {}]   ;;  %s871_s2 = inlined_call_operand.hbm [shape: f32[11,32], index: 2, kind: input, shape index: {}]   ;;  %s872_s3 = inlined_call_operand.vmem [shape: f32[1,32], index: 3, kind: input, shape index: {}]   ;;  %s873_s4 = inlined_call_operand.vmem [shape: f32[3,32], index: 4, kind: input, shape index: {}]   ;;  %s874_s5 = inlined_call_operand.vmem [shape: f32[1,32], index: 5, kind: input, shape index: {}]   ;;  %s875_s6 = inlined_call_operand.vmem [shape: f32[32,32], index: 6, kind: input, shape index: {}]   ;;  %s876_s7 = inlined_call_operand.hbm [shape: f32[32,32], index: 7, kind: input, shape index: {}]   ;;  %s877_s8 = inlined_call_operand.vmem [shape: f32[1,32], index: 8, kind: input, shape index: {}]   ;;  %s878_s9 = inlined_call_operand.vmem [shape: f32[1,32], index: 9, kind: input, shape index: {}]   ;;  %s879_s10 = inlined_call_operand.<no memory space> [shape: f32[1,1], index: 10, kind: input, shape index: {}]   ;;  %s880_s11 = inlined_call_operand.hbm [shape: f32[1,8], index: 11, kind: output, shape index: {}]  }
   0x1   :  { %18 = vsyncpa [#allocation7], 0 }
   0x2   :  { %19 = vsyncpa [#allocation5], 0  ;;  %s703_s17 = smov [#allocation6]   ;;  %s609_s21 = scalar_lea.hbm %s871_s2, 256 }
   0x3   :  { %s37_s18 = sshll.u32 %s703_s17, 4  ;;  %p610_p0 = scmp.ne.s32.totalorder %s871_s2, %s609_s21  ;;  %s38_s18 = int_to_ptr.vmem [resolvable:$true] %s37_s18 }
   0x4   :  { %p613_p1 = scmp.lt.u32.totalorder %s609_s21, %s871_s2 }
   0x6   :  { %p615_p2 = pnand %p613_p1, %p610_p0 }
   0x8   :  { %618 = shalt.err (!%p615_p2)
}
   0x9   :  { %s619_s26 = scalar_lea.vmem %s38_s18, 256  ;;  %p624_p4 = scmp.lt.s32.totalorder %s38_s18, %s38_s18 }
   0xa   :  { %p620_p3 = scmp.ne.s32.totalorder %s38_s18, %s619_s26  ;;  %p625_p5 = scmp.lt.s32.totalorder %s619_s26, %s619_s26 }
   0xc   :  { %p626_p6 = por %p625_p5, %p624_p4 }
   0xe   :  { %p627_p7 = pnand %p626_p6, %p620_p3 }
  0x10   :  { %630 = shalt.err (!%p627_p7)
}
  0x11   :  { %s704_s27 = smov 128   ;;  %s705_s28 = smov 8  }
  0x12   :  { %43 = dma.hbm_to_vmem [thread:$0]  %s871_s2, 256, %s38_s18, [#allocation7], %s704_s27, %s704_s27, %s705_s28  }
  0x13   :  { %s706_s12 = smov [#allocation3]   ;;  %s707_s14 = smov [#allocation8]  }
  0x14   :  { %s26_s13 = sshll.u32 %s706_s12, 4  ;;  %s57_s15 = sshll.u32 %s707_s14, 4  ;;  %s27_s13 = int_to_ptr.vmem [resolvable:$true] %s26_s13  ;;  %s58_s15 = int_to_ptr.vmem [resolvable:$true] %s57_s15 }
  0x15   :  { %s631_s19 = scalar_lea.hbm %s869_s0, 128 }
  0x16   :  { %p632_p8 = scmp.ne.s32.totalorder %s869_s0, %s631_s19  ;;  %p635_p9 = scmp.lt.u32.totalorder %s631_s19, %s869_s0 }
  0x18   :  { %p637_p10 = pnand %p635_p9, %p632_p8 }
  0x1a   :  { %640 = shalt.err (!%p637_p10)
}
  0x1b   :  { %s641_s2 = scalar_lea.vmem %s27_s13, 128  ;;  %p646_p12 = scmp.lt.s32.totalorder %s27_s13, %s27_s13 }
  0x1c   :  { %p642_p11 = scmp.ne.s32.totalorder %s27_s13, %s641_s2  ;;  %p647_p13 = scmp.lt.s32.totalorder %s641_s2, %s641_s2 }
  0x1e   :  { %p648_p0 = por %p647_p13, %p646_p12 }
  0x20   :  { %p649_p1 = pnand %p648_p0, %p642_p11 }
  0x22   :  { %652 = shalt.err (!%p649_p1)
}
  0x23   :  { %29 = dma.hbm_to_vmem [thread:$0]  %s869_s0, 128, %s27_s13, [#allocation4]  }
  0x24   :  { %s653_s29 = scalar_lea.hbm %s876_s7, 512 }
  0x25   :  { %p654_p2 = scmp.ne.s32.totalorder %s876_s7, %s653_s29  ;;  %p657_p3 = scmp.lt.u32.totalorder %s653_s29, %s876_s7 }
  0x27   :  { %p659_p4 = pnand %p657_p3, %p654_p2 }
  0x29   :  { %662 = shalt.err (!%p659_p4)
}
  0x2a   :  { %s663_s17 = scalar_lea.vmem %s58_s15, 512  ;;  %p668_p6 = scmp.lt.s32.totalorder %s58_s15, %s58_s15 }
  0x2b   :  { %p664_p5 = scmp.ne.s32.totalorder %s58_s15, %s663_s17  ;;  %p669_p7 = scmp.lt.s32.totalorder %s663_s17, %s663_s17 }
  0x2d   :  { %p670_p8 = por %p669_p7, %p668_p6 }
  0x2f   :  { %p671_p9 = pnand %p670_p8, %p664_p5 }
  0x31   :  { %674 = shalt.err (!%p671_p9)
}
  0x32   :  { %63 = dma.hbm_to_vmem [thread:$0]  %s876_s7, 512, %s58_s15, [#allocation7], %s704_s27, %s704_s27, %s705_s28  }
  0x33   :  { %697 = dma.done.wait [#allocation4], 128  }
  0x34   :  { %698 = vsyncadd [#allocation4], 4294967168 }
  0x35   :  { %699 = dma.done.wait [#allocation7], 768  }
  0x36   :  { %700 = vsyncadd [#allocation7], 4294966528  ;;  %v708_v0 = vmov 0.0|0.0   ;;  %v709_v1 = vmov 0.0   ;;  %vm710_vm0 = vmmov 0   ;;  %vm94_vm1 = vcmask 1042432  }
  0x37   :  { %583 = vmatprep.subr.bf16.mxu0 %v708_v0  ;;  %551 = vmatprep.subr.mxu1 %v709_v1  ;;  %vm711_vm2 = vmmov 1   ;;  %vm177_vm4 = vcmask 23552   ;;  %v81_v2 = vld [vmem:[#allocation6] sm:$0xff]  ;;  %v82_v3 = vld [vmem:[#allocation6 + $0x8] sm:$0x7]  ;;  %v80_v6 = vld [vmem:[%s870_s1] sm:$0xff]  ;;  %v421_v39 = vstv %s879_s10 }
  0x38   :  { %553 = vmatprep.mubr.msk.f32.mxu1 %vm710_vm0, %v709_v1  ;;  %548 = vmatprep.mubr.msk.f32.mxu0 %vm710_vm0, %v709_v1  ;;  %vm585_vm3 = vmpackc.low %vm94_vm1, %vm711_vm2  ;;  %v169_v4 = vld [vmem:[%s873_s4] sm:$0x7]  ;;  %v584_v5 = vpack.c.bf16 %v82_v3, %v81_v2  ;;  %v259_v7 = vld [vmem:[#allocation8] sm:$0xff]  ;;  %vm90_vm5 = vcmask 89088   ;;  %vm263_vm6 = vcmask 261120   ;;  %s712_s14 = smov [#allocation9]  }
  0x39   :  { %552 = vmatpush3.msk.msra.mxu1 %vm94_vm1, %v169_v4  ;;  %v260_v8 = vld [vmem:[#allocation8 + $0x8] sm:$0xff]  ;;  %v256_v10 = vld [vmem:[%s875_s6 + $0x8] sm:$0xff]  ;;  %v262_v15 = vld [vmem:[#allocation8 + $0x18] sm:$0xff]  ;;  %s506_s16 = sshll.u32 %s712_s14, 4  ;;  %vm498_vm7 = vcmask 57344   ;;  %s507_s16 = int_to_ptr.vmem [resolvable:$true] %s506_s16 }
  0x3a   :  { %554 = vmatmul.mubr.msk.f32.vlgmr.msra.gmra.mrb[0].mxu1 %vm177_vm4, %v80_v6  ;;  %587 = vmatprep.subr.bf16.mxu1 %v708_v0  ;;  %v255_v9 = vld [vmem:[%s875_s6] sm:$0xff]  ;;  %v588_v12 = vpack.c.bf16 %v260_v8, %v259_v7  ;;  %v261_v14 = vld [vmem:[#allocation8 + $0x10] sm:$0xff]  ;;  %v257_v17 = vld [vmem:[%s875_s6 + $0x10] sm:$0xff]  ;;  %s679_s17 = scalar_lea.vmem %s507_s16, 32  ;;  %p680_p11 = scmp.lt.s32.totalorder %s507_s16, %s507_s16 }
  0x3b   :  { %586 = vmatpush3.bf16.msk.msra.mxu0 %vm585_vm3, %v584_v5  ;;  %v79_v11 = vld [vmem:[#allocation3] sm:$0xff]  ;;  %v594_v13 = vpack.c.bf16 %v256_v10, %v255_v9  ;;  %564 = vmatprep.mubr.msk.f32.mxu1 %vm710_vm0, %v709_v1  ;;  %v591_v16 = vpack.c.bf16 %v262_v15, %v261_v14  ;;  %v258_v18 = vld [vmem:[%s875_s6 + $0x18] sm:$0xff] }
  0x3c   :  { %593 = vmatprep.subr.bf16.mxu0 %v708_v0  ;;  %589 = vmatpush3.bf16.msra.mxu1 %v588_v12  ;;  %v597_v19 = vpack.c.bf16 %v258_v18, %v257_v17  ;;  %v519_v20 = vld [vmem:[%s874_s5] ss:$0 sm:$0xff] }
  0x3d   :  { %590 = vmatprep.subr.bf16.mxu1 %v708_v0  ;;  %v516_v24 = vld [vmem:[%s872_s3] ss:$0 sm:$0xff] }
  0x3e   :  { %549 = vmatmul.mubr.msk.f32.vlgmr.msra.gmra.mrb[0].mxu0 %vm90_vm5, %v79_v11  ;;  %v524_v33 = vld [vmem:[%s877_s8] ss:$0 sm:$0xff]  ;;  %s675_s8 = scalar_lea.vmem %s507_s16, 16 }
  0x3f   :  { %595 = vmatpush3.bf16.msra.mxu0 %v594_v13  ;;  %575 = vmatprep.mubr.msk.f32.mxu0 %vm710_vm0, %v709_v1  ;;  %v419_v38 = vld [vmem:[%s878_s9] sm:$0x1]  ;;  %p676_p10 = scmp.ne.s32.totalorder %s507_s16, %s675_s8  ;;  %p681_p12 = scmp.lt.s32.totalorder %s679_s17, %s675_s8 }
  0x40   :  { %596 = vmatprep.subr.bf16.mxu0 %v708_v0  ;;  %592 = vmatpush3.bf16.msra.mxu1 %v591_v16 }
  0x41   :  { %578 = vmatprep.subr.mxu1 %v709_v1  ;;  %p682_p13 = por %p681_p12, %p680_p11 }
  0x43   :  { %598 = vmatpush3.bf16.msra.mxu0 %v597_v19  ;;  %p683_p0 = pnand %p682_p13, %p676_p10 }
 0x10d   :  { %v250_v21 = vpop.f32.mrb[0].mxu1 }
 0x10e   :  { %v251_v22 = vadd.f32 %v519_v20, %v250_v21  ;;  %v555_v23 = vpop.f32.mrb[1].mxu1 }
 0x110   :  { %v254_v25 = vmax.f32 %v251_v22, 0.0 }
 0x111   :  { %v164_v26 = vpop.f32.mrb[0].mxu0 }
 0x112   :  { %v165_v27 = vadd.f32 %v516_v24, %v164_v26  ;;  %v550_v28 = vpop.f32.mrb[1].mxu0  ;;  %565 = vmatmul.mubr.msk.f32.vlgmr.msra.gmra.mrb[2].mxu1 %vm263_vm6, %v254_v25 }
 0x113   :  { %580 = vmatprep.mubr.msk.f32.mxu1 %vm710_vm0, %v709_v1 }
 0x114   :  { %v168_v29 = vmax.f32 %v165_v27, 0.0 }
 0x116   :  { %576 = vmatmul.mubr.msk.f32.vlgmr.msra.gmra.mrb[2].mxu0 %vm263_vm6, %v168_v29 }
 0x1e5   :  { %v333_v30 = vpop.f32.mrb[2].mxu1 }
 0x1e6   :  { %v566_v31 = vpop.f32.mrb[3].mxu1 }
 0x1e9   :  { %v406_v32 = vpop.f32.mrb[2].mxu0 }
 0x1ea   :  { %v407_v34 = vadd.f32 %v406_v32, %v333_v30  ;;  %v577_v35 = vpop.f32.mrb[3].mxu0 }
 0x1ec   :  { %v417_v36 = vadd.f32 %v524_v33, %v407_v34 }
 0x1ee   :  { %v418_v37 = vmax.f32 %v417_v36, 0.0 }
 0x1f0   :  { %579 = vmatpush3.xpose.msk.msra.mxu1 %vm263_vm6, %v418_v37 }
 0x1f3   :  { %581 = vmatmul.mubr.msk.f32.vlgmr.msra.gmra.mrb[4].mxu1 %vm263_vm6, %v419_v38 }
 0x2c6   :  { %v494_v40 = vpop.f32.mrb[4].mxu1 }
 0x2c7   :  { %v495_v41 = vadd.f32 %v494_v40, %v421_v39  ;;  %v582_v42 = vpop.f32.mrb[5].mxu1 }
 0x2c9   :  { %499 = vst.msk [vmem:[#allocation9] sm:$0x1] %vm498_vm7, %v495_v41 }
 0x2ca   :  { %686 = shalt.err (!%p683_p0)
}
 0x2cb   :  { %s687_s10 = scalar_lea.hbm %s880_s11, 16 }
 0x2cc   :  { %p688_p1 = scmp.ne.s32.totalorder %s880_s11, %s687_s10  ;;  %p691_p2 = scmp.lt.u32.totalorder %s687_s10, %s880_s11 }
 0x2ce   :  { %p693_p3 = pnand %p691_p2, %p688_p1 }
 0x2d0   :  { %696 = shalt.err (!%p693_p3)
}
 0x2d1   :  { %509 = dma.vmem_to_hbm [thread:$0]  %s507_s16, 16, %s880_s11, [#allocation5]  }
 0x2d2   :  { %701 = dma.done.wait [#allocation5], 16  }
 0x2d3   :  { %702 = vsyncadd [#allocation5], 4294967280 }
 0x2d4   :  { %513 = vsyncpa [#allocation4], 1 }
 0x2d5   :  { %514 = vsyncpa [#allocation7], 1 }
 0x2d6   :  { %515 = vsyncpa [#allocation5], 1 }

</bundles_post_ra>
